<compile_context>
chip_gen: v6e
topology: v6e:2x2x1
jax: 0.10.0
libtpu: 0.0.40
codegen_flags: <defaults>
</compile_context>

<pallas_src>
import jax
import jax.numpy as jnp
from jax.experimental import pallas as pl
from jax.experimental.pallas import tpu as pltpu


def dwt_kernel(x_ref, ct_ref, out_ref):
    # x_ref : (Mblk, W)  slab of `imgs_per_step` images stacked along rows
    # ct_ref: (W, W)     fused column analysis matrix [0.5*Lc | 0.5*Hc]
    # out_ref: (4, Mblk//2, W//2)  subbands LL, HL, LH, HH
    m_half = out_ref.shape[1]          # imgs_per_step * H/2
    w2 = out_ref.shape[2]              # W/2

    # Row-pair combine on the VPU (strided sublane reads, no dense row matrix).
    xe = x_ref[pl.ds(0, m_half, 2), :]     # even rows of every image
    xo = x_ref[pl.ds(1, m_half, 2), :]     # odd rows of every image
    s = (xe + xo).astype(ct_ref.dtype)     # row-pair sum   -> LL / HL
    d = (xo - xe).astype(ct_ref.dtype)     # row-pair diff  -> LH / HH

    # Column (lane-direction) combine on the MXU: one fused (W, W) matrix,
    # two matmuls with M = imgs_per_step * H/2.
    ct = ct_ref[...]
    ys = jnp.dot(s, ct, preferred_element_type=jnp.float32)   # (m_half, W)
    yd = jnp.dot(d, ct, preferred_element_type=jnp.float32)   # (m_half, W)

    odt = out_ref.dtype
    out_ref[0] = ys[:, :w2].astype(odt)    # LL =  x1 + x2 + x3 + x4
    out_ref[1] = ys[:, w2:].astype(odt)    # HL = -x1 - x2 + x3 + x4
    out_ref[2] = yd[:, :w2].astype(odt)    # LH = -x1 + x2 - x3 + x4
    out_ref[3] = yd[:, w2:].astype(odt)    # HH =  x1 - x2 - x3 + x4


def _haar_col_matrix(W, dtype):
    """Fused column analysis matrix C^T = [0.5*Lc | 0.5*Hc], shape (W, W)."""
    W2 = W // 2
    j = jnp.arange(W2)
    ct = jnp.zeros((W, W), dtype)
    # Low-pass (cols 0..W2-1):  0.5 * (even_col + odd_col)
    ct = ct.at[2 * j, j].set(0.5).at[2 * j + 1, j].set(0.5)
    # High-pass (cols W2..W-1): 0.5 * (odd_col - even_col)
    ct = ct.at[2 * j, W2 + j].set(-0.5).at[2 * j + 1, W2 + j].set(0.5)
    return ct


def _pick_images_per_step(n_img, H, W, itemsize, budget_bytes=4 << 20):
    """Largest divisor of n_img whose input block fits the VMEM budget, keeps
    sublane-legal block shapes, and (if possible) leaves >= 2 grid steps so
    both v7x TensorCores get work."""
    H2 = H // 2
    divs = [d for d in range(1, n_img + 1) if n_img % d == 0]
    ok = [d for d in divs
          if d * H * W * itemsize <= budget_bytes
          and ((d * H) % 8 == 0 or d == n_img)
          and ((d * H2) % 8 == 0 or d == n_img)]
    if not ok:
        ok = [n_img]
    multi = [d for d in ok if n_img // d >= 2]
    return max(multi) if multi else max(ok)


def dwt_pallas(x):
    B, C, H, W = x.shape
    assert H % 2 == 0 and W % 2 == 0, "DWT needs even spatial dims"
    H2, W2 = H // 2, W // 2
    N = B * C

    nb = _pick_images_per_step(N, H, W, x.dtype.itemsize)
    grid = (N // nb,)
    mblk = nb * H

    # Keep the matmul in the input dtype (bf16 stays bf16, f32 stays f32);
    # +/-0.5 Haar weights are exact in either.
    mm_dtype = x.dtype if x.dtype in (jnp.bfloat16, jnp.float32) else jnp.float32
    ct = _haar_col_matrix(W, mm_dtype)

    # Free, contiguous reshape: stack all (B*C) images along the row axis.
    x2d = x.reshape(N * H, W)

    out = pl.pallas_call(
        dwt_kernel,
        out_shape=jax.ShapeDtypeStruct((4, N * H2, W2), x.dtype),
        grid=grid,
        in_specs=[
            pl.BlockSpec((mblk, W), lambda i: (i, 0)),
            pl.BlockSpec((W, W), lambda i: (0, 0)),
        ],
        out_specs=pl.BlockSpec((4, nb * H2, W2), lambda i: (0, i, 0)),
        compiler_params=pltpu.CompilerParams(
            dimension_semantics=("parallel",)),
    )(x2d, ct)

    # (4, B*C*H2, W2) -> (4*B, C, H2, W2): identical memory order to
    # torch.cat((LL, HL, LH, HH), 0); the reshape is free (contiguous).
    return out.reshape(4 * B, C, H2, W2)


def dwt_ref(x):
    x01 = x[:, :, 0::2, :] / 2
    x02 = x[:, :, 1::2, :] / 2
    x1 = x01[:, :, :, 0::2]
    x2 = x02[:, :, :, 0::2]
    x3 = x01[:, :, :, 1::2]
    x4 = x02[:, :, :, 1::2]
    return jnp.concatenate(
        [x1 + x2 + x3 + x4, -x1 - x2 + x3 + x4,
         -x1 + x2 - x3 + x4, x1 - x2 - x3 + x4], axis=0)


if __name__ == "__main__":
    key = jax.random.PRNGKey(0)
    x = jax.random.normal(key, (2, 4, 16, 16), dtype=jnp.float32)

    out = jax.block_until_ready(dwt_pallas(x))
    ref = dwt_ref(x)

    assert out.shape == (8, 4, 8, 8), out.shape
    assert jnp.allclose(out, ref, atol=1e-5, rtol=1e-5), "mismatch vs reference"
    print("KERNEL_OK")
</pallas_src>

<mosaic_0001>
module attributes {stable_mosaic.version = 11 : i64} {
  func.func @dwt_kernel(%arg0: i32, %arg1: memref<64x16xf32, #tpu.memory_space<vmem>>, %arg2: memref<16x16xf32, #tpu.memory_space<vmem>>, %arg3: memref<4x32x8xf32, #tpu.memory_space<vmem>>) attributes {dimension_semantics = [#tpu.dimension_semantics<parallel>], iteration_bounds = array<i64: 2>, scalar_prefetch = 0 : i64, scratch_operands = 0 : i64, tpu.core_type = #tpu.core_type<tc>, window_params = [{transform_indices = @transform_0, window_bounds = array<i64: 64, 16>}, {pipeline_mode = #tpu.pipeline_mode<synchronous>, transform_indices = @transform_1, window_bounds = array<i64: 16, 16>}, {transform_indices = @transform_2, window_bounds = array<i64: 4, 32, 8>}]} {
    %c0 = arith.constant 0 : index
    %c0_0 = arith.constant 0 : index
    %0 = tpu.strided_load %arg1[%c0, %c0_0] {strides = array<i32: 2, 1>} : memref<64x16xf32, #tpu.memory_space<vmem>>, vector<32x16xf32>
    %c1 = arith.constant 1 : index
    %c0_1 = arith.constant 0 : index
    %1 = tpu.strided_load %arg1[%c1, %c0_1] {strides = array<i32: 2, 1>} : memref<64x16xf32, #tpu.memory_space<vmem>>, vector<32x16xf32>
    %2 = arith.addf %0, %1 : vector<32x16xf32>
    %3 = arith.subf %1, %0 : vector<32x16xf32>
    %c0_2 = arith.constant 0 : index
    %c0_3 = arith.constant 0 : index
    %4 = vector.load %arg2[%c0_2, %c0_3] : memref<16x16xf32, #tpu.memory_space<vmem>>, vector<16x16xf32>
    %cst = arith.constant dense<0.000000e+00> : vector<32x16xf32>
    %5 = tpu.matmul %2, %4, %cst {dimension_numbers = #tpu.dot_dimension_numbers<[1], [0], [0], [1], [0, 0, 1, 1], [], []>} : vector<32x16xf32>, vector<16x16xf32>, vector<32x16xf32> -> vector<32x16xf32>
    %cst_4 = arith.constant dense<0.000000e+00> : vector<32x16xf32>
    %6 = tpu.matmul %3, %4, %cst_4 {dimension_numbers = #tpu.dot_dimension_numbers<[1], [0], [0], [1], [0, 0, 1, 1], [], []>} : vector<32x16xf32>, vector<16x16xf32>, vector<32x16xf32> -> vector<32x16xf32>
    %7 = vector.extract_strided_slice %5 {offsets = [0, 0], sizes = [32, 8], strides = [1, 1]} : vector<32x16xf32> to vector<32x8xf32>
    %c0_5 = arith.constant 0 : index
    %c0_6 = arith.constant 0 : index
    %c0_7 = arith.constant 0 : index
    %8 = vector.load %arg3[%c0_5, %c0_6, %c0_7] : memref<4x32x8xf32, #tpu.memory_space<vmem>>, vector<1x32x8xf32>
    %9 = vector.shape_cast %8 : vector<1x32x8xf32> to vector<32x8xf32>
    %10 = vector.shape_cast %7 : vector<32x8xf32> to vector<1x32x8xf32>
    tpu.vector_store %arg3[%c0_5, %c0_6, %c0_7], %10 {strides = array<i32>} : memref<4x32x8xf32, #tpu.memory_space<vmem>>, vector<1x32x8xf32>,
    %11 = vector.extract_strided_slice %5 {offsets = [0, 8], sizes = [32, 8], strides = [1, 1]} : vector<32x16xf32> to vector<32x8xf32>
    %c1_8 = arith.constant 1 : index
    %c0_9 = arith.constant 0 : index
    %c0_10 = arith.constant 0 : index
    %12 = vector.load %arg3[%c1_8, %c0_9, %c0_10] : memref<4x32x8xf32, #tpu.memory_space<vmem>>, vector<1x32x8xf32>
    %13 = vector.shape_cast %12 : vector<1x32x8xf32> to vector<32x8xf32>
    %14 = vector.shape_cast %11 : vector<32x8xf32> to vector<1x32x8xf32>
    tpu.vector_store %arg3[%c1_8, %c0_9, %c0_10], %14 {strides = array<i32>} : memref<4x32x8xf32, #tpu.memory_space<vmem>>, vector<1x32x8xf32>,
    %15 = vector.extract_strided_slice %6 {offsets = [0, 0], sizes = [32, 8], strides = [1, 1]} : vector<32x16xf32> to vector<32x8xf32>
    %c2 = arith.constant 2 : index
    %c0_11 = arith.constant 0 : index
    %c0_12 = arith.constant 0 : index
    %16 = vector.load %arg3[%c2, %c0_11, %c0_12] : memref<4x32x8xf32, #tpu.memory_space<vmem>>, vector<1x32x8xf32>
    %17 = vector.shape_cast %16 : vector<1x32x8xf32> to vector<32x8xf32>
    %18 = vector.shape_cast %15 : vector<32x8xf32> to vector<1x32x8xf32>
    tpu.vector_store %arg3[%c2, %c0_11, %c0_12], %18 {strides = array<i32>} : memref<4x32x8xf32, #tpu.memory_space<vmem>>, vector<1x32x8xf32>,
    %19 = vector.extract_strided_slice %6 {offsets = [0, 8], sizes = [32, 8], strides = [1, 1]} : vector<32x16xf32> to vector<32x8xf32>
    %c3 = arith.constant 3 : index
    %c0_13 = arith.constant 0 : index
    %c0_14 = arith.constant 0 : index
    %20 = vector.load %arg3[%c3, %c0_13, %c0_14] : memref<4x32x8xf32, #tpu.memory_space<vmem>>, vector<1x32x8xf32>
    %21 = vector.shape_cast %20 : vector<1x32x8xf32> to vector<32x8xf32>
    %22 = vector.shape_cast %19 : vector<32x8xf32> to vector<1x32x8xf32>
    tpu.vector_store %arg3[%c3, %c0_13, %c0_14], %22 {strides = array<i32>} : memref<4x32x8xf32, #tpu.memory_space<vmem>>, vector<1x32x8xf32>,
    return
  }
  func.func @transform_0(%arg0: i32) -> (i32, i32) {
    %c0_i32 = arith.constant 0 : i32
    %c0_i32_0 = arith.constant 0 : i32
    return %arg0, %c0_i32 : i32, i32
  }
  func.func @transform_1(%arg0: i32) -> (i32, i32) {
    %c0_i32 = arith.constant 0 : i32
    %c0_i32_0 = arith.constant 0 : i32
    %c0_i32_1 = arith.constant 0 : i32
    return %c0_i32, %c0_i32_0 : i32, i32
  }
  func.func @transform_2(%arg0: i32) -> (i32, i32, i32) {
    %c0_i32 = arith.constant 0 : i32
    %c0_i32_0 = arith.constant 0 : i32
    %c0_i32_1 = arith.constant 0 : i32
    return %c0_i32, %arg0, %c0_i32_0 : i32, i32, i32
  }
}

</mosaic_0001>

<bundles_post_ra>
// kernel: tpu_custom_call.1
= control target key start
LH: loop header
LB: loop body
LE: loop exit
PB: predicated region body
PF: predicated region fallthrough
CT: control target
= control target key end

     0   :  { %s704_s9 = smov 0   ;;  %s706_s10 = smov 0   ;;  %s818_s0 = inlined_call_operand.vmem [shape: f32[128,16], index: 0, kind: input, shape index: {}]   ;;  %s819_s1 = inlined_call_operand.vmem [shape: f32[16,16], index: 1, kind: input, shape index: {}]   ;;  %s820_s2 = inlined_call_operand.vmem [shape: f32[4,64,8], index: 2, kind: output, shape index: {}]  }
   0x1   :  { %s708_s11 = smov 0  }
   0x2 LB: > { %s717_s12 = sadd.s32 4294967295, %s686_s11   ;;  %s719_s13 = sadd.s32 1, %s686_s11   ;;  %s686_s11 = sphi %s708_s11, %s824_s11   ;;  %s682_s10 = sphi %s706_s10, %s823_s10   ;;  %s678_s9 = sphi %s704_s9, %s822_s9  }
   0x3   : > { %s63_s14 = ssub.s32 %s686_s11, %s719_s13  ;;  %s66_s15 = sadd.s32 1, %s682_s10 }
   0x4   : > { %p64_p0 = scmp.eq.s32.totalorder %s63_s14, 0  ;;  %p76_p1 = scmp.ne.s32.totalorder %s682_s10, %s678_s9 }
   0x5   : > { %p77_p2 = scmp.eq.s32.totalorder %s717_s12, 1  ;;  %p570_p3 = scmp.ge.s32.totalorder %s686_s11, 1 }
   0x6   : > { %s727_s16 = scalar_select %p64_p0, %s682_s10, %s66_s15  }
   0x7   : > { %p729_p4 = por %p77_p2, %p76_p1  ;;  %p113_p5 = scmp.lt.s32.totalorder %s686_s11, 3 }
   0x9   : > { %p114_p6 = pnand %p570_p3, %p113_p5 }
   0xa   : > { %s572_s22 = sshll.u32 (!%p114_p6), %s717_s12, 3  ;;  %s131_s27 = sand.u32 (!%p114_p6), 1, %s678_s9  }
   0xb   : > { %117 = sbr.rel (%p114_p6) target bundleno = 352 (0x160), region = 28  ;;  %p135_p7 = scmp.lt.s32.totalorder (!%p114_p6), %s572_s22, 15 }
   0xc   : > { %s571_s28 = sshll.u32 (!%p114_p6), %s131_s27, 7  ;;  %s688_s30 = smov (!%p114_p6), 120  }
   0xd   : > { %s752_s29 = scalar_lea.vmem (!%p114_p6), [#allocation2], %s571_s28 }
  0x10   : > { %v165_v0 = vld [vmem:[%s819_s1 + $0x8] sm:$0xff]  ;;  %v164_v1 = vld [vmem:[%s819_s1] sm:$0xff]  ;;  %s826_s22 = smov (!%p135_p7, %s572_s22), 15  ;;  %vm166_vm0 = vcmask 130048   ;;  %vm361_vm1 = vcmask 64512   ;;  %s606_s3 = sshll.u32 (%p729_p4), %s717_s12, 5 }
  0x11   : > { %619 = vmatprep.subr.mxu0 %v165_v0  ;;  %629 = vmatprep.subr.mxu1 %v165_v0  ;;  %s573_s23 = sshll.u32 %s826_s22, 3  ;;  %s422_s6 = scalar_lea.vmem (%p729_p4), %s820_s2, %s606_s3 }
  0x12   : > { %620 = vmatpush3.msra.mxu0 %v165_v0  ;;  %630 = vmatpush3.msra.mxu1 %v165_v0  ;;  %s138_s26 = scalar_lea.vmem %s818_s0, %s573_s23 }
  0x13   : > { %621 = vmatprep.subr.mxu0 %v164_v1  ;;  %631 = vmatprep.subr.mxu1 %v164_v1  ;;  %v141_v2 = vld [vmem:[%s138_s26] ss:$2 sm:$0xff]  ;;  %v577_v3 = vld [vmem:[%s138_s26 + $0x1] ss:$2 sm:$0xff]  ;;  %v574_v4 = vld [vmem:[%s138_s26 + $0x10] ss:$2 sm:$0xff] }
  0x14   : > { %622 = vmatpush3.msra.mxu0 %v164_v1  ;;  %632 = vmatpush3.msra.mxu1 %v164_v1  ;;  %v156_v5 = vadd.f32 %v577_v3, %v141_v2  ;;  %v160_v6 = vsub.f32 %v577_v3, %v141_v2  ;;  %v578_v7 = vld [vmem:[%s138_s26 + $0x11] ss:$2 sm:$0xff]  ;;  %v575_v8 = vld [vmem:[%s138_s26 + $0x20] ss:$2 sm:$0xff]  ;;  %v579_v9 = vld [vmem:[%s138_s26 + $0x21] ss:$2 sm:$0xff] }
  0x15   : > { %v157_v10 = vadd.f32 %v578_v7, %v574_v4  ;;  %v161_v11 = vsub.f32 %v578_v7, %v574_v4  ;;  %v158_v12 = vadd.f32 %v579_v9, %v575_v8  ;;  %v576_v13 = vld [vmem:[%s138_s26 + $0x30] ss:$2 sm:$0xff]  ;;  %v580_v14 = vld [vmem:[%s138_s26 + $0x31] ss:$2 sm:$0xff]  ;;  %v162_v15 = vsub.f32 %v579_v9, %v575_v8 }
  0x16   : > { %623 = vmatprep.mubr.msk.f32.mxu0 %vm166_vm0, %v156_v5  ;;  %633 = vmatprep.mubr.msk.f32.mxu1 %vm166_vm0, %v160_v6  ;;  %v159_v16 = vadd.f32 %v580_v14, %v576_v13  ;;  %v163_v17 = vsub.f32 %v580_v14, %v576_v13 }
  0x17   : > { %624 = vmatmul.mubr.msk.f32.vlgmr.msra.gmra.mxu0 %vm166_vm0, %v157_v10  ;;  %634 = vmatmul.mubr.msk.f32.vlgmr.msra.gmra.mxu1 %vm166_vm0, %v161_v11 }
  0x18   : > { %626 = vmatprep.mubr.msk.f32.mxu0 %vm166_vm0, %v158_v12  ;;  %636 = vmatprep.mubr.msk.f32.mxu1 %vm166_vm0, %v162_v15 }
  0x1b   : > { %627 = vmatmul.mubr.msk.f32.gmra.mxu0 %vm166_vm0, %v159_v16  ;;  %637 = vmatmul.mubr.msk.f32.gmra.mxu1 %vm166_vm0, %v163_v17 }
  0xd7   : > { %v625_v18 = vpop.f32.mrf.mxu0  ;;  %v635_v19 = vpop.f32.mrf.mxu1 }
  0xd8   : > { %363 = vst.msk [vmem:[%s752_s29 + $0x8] sm:$0xff] %vm361_vm1, %v625_v18  ;;  %594 = vst.msk [vmem:[%s752_s29 + $0x48] sm:$0xff] %vm361_vm1, %v635_v19  ;;  %398 = vrot.lane.b32.xlu1 %v635_v19, %s688_s30  ;;  %372 = vrot.lane.b32.xlu0 %v625_v18, %s688_s30 }
  0xd9   : > { %v245_v20 = vpop.f32.mrf.mxu0  ;;  %v342_v21 = vpop.f32.mrf.mxu1 }
  0xda   : > { %362 = vst.msk [vmem:[%s752_s29] sm:$0xff] %vm361_vm1, %v245_v20  ;;  %593 = vst.msk [vmem:[%s752_s29 + $0x40] sm:$0xff] %vm361_vm1, %v342_v21 }
  0xdb   : > { %v628_v22 = vpop.f32.mrf.mxu0  ;;  %v638_v23 = vpop.f32.mrf.mxu1 }
  0xdc   : > { %365 = vst.msk [vmem:[%s752_s29 + $0x18] sm:$0xff] %vm361_vm1, %v628_v22  ;;  %370 = vrot.lane.b32.xlu0 %v245_v20, %s688_s30  ;;  %376 = vrot.lane.b32.xlu1 %v628_v22, %s688_s30  ;;  %596 = vst.msk [vmem:[%s752_s29 + $0x58] sm:$0xff] %vm361_vm1, %v638_v23 }
  0xdd   : > { %v255_v24 = vpop.f32.mrf.mxu0  ;;  %v352_v25 = vpop.f32.mrf.mxu1 }
  0xde   : > { %364 = vst.msk [vmem:[%s752_s29 + $0x10] sm:$0xff] %vm361_vm1, %v255_v24  ;;  %595 = vst.msk [vmem:[%s752_s29 + $0x50] sm:$0xff] %vm361_vm1, %v352_v25 }
  0xdf   : > { %v483_v35 = vld [vmem:[%s752_s29 + $0x8] sm:$0xff] (%p729_p4) }
  0xe0   : > { %396 = vrot.lane.b32.xlu0 %v342_v21, %s688_s30  ;;  %374 = vrot.lane.b32.xlu1 %v255_v24, %s688_s30  ;;  %484 = vst [vmem:[%s422_s6 + $0x8] sm:$0xff] (%p729_p4), %v483_v35  ;;  %v499_v43 = vld [vmem:[%s752_s29 + $0x48] sm:$0xff] (%p729_p4) }
  0xe1   : > { %v481_v34 = vld [vmem:[%s752_s29] sm:$0xff] (%p729_p4)  ;;  %500 = vst [vmem:[%s422_s6 + $0x88] sm:$0xff] (%p729_p4), %v499_v43 }
  0xe2   : > { %482 = vst [vmem:[%s422_s6] sm:$0xff] (%p729_p4), %v481_v34  ;;  %v497_v42 = vld [vmem:[%s752_s29 + $0x40] sm:$0xff] (%p729_p4) }
  0xe3   : > { %v487_v37 = vld [vmem:[%s752_s29 + $0x18] sm:$0xff] (%p729_p4)  ;;  %498 = vst [vmem:[%s422_s6 + $0x80] sm:$0xff] (%p729_p4), %v497_v42 }
  0xe4   : > { %400 = vrot.lane.b32.xlu0 %v352_v25, %s688_s30  ;;  %402 = vrot.lane.b32.xlu1 %v638_v23, %s688_s30  ;;  %488 = vst [vmem:[%s422_s6 + $0x18] sm:$0xff] (%p729_p4), %v487_v37  ;;  %v503_v45 = vld [vmem:[%s752_s29 + $0x58] sm:$0xff] (%p729_p4) }
  0xe5   : > { %v485_v36 = vld [vmem:[%s752_s29 + $0x10] sm:$0xff] (%p729_p4)  ;;  %504 = vst [vmem:[%s422_s6 + $0x98] sm:$0xff] (%p729_p4), %v503_v45 }
  0xe6   : > { %486 = vst [vmem:[%s422_s6 + $0x10] sm:$0xff] (%p729_p4), %v485_v36  ;;  %v501_v44 = vld [vmem:[%s752_s29 + $0x50] sm:$0xff] (%p729_p4) }
  0xe7   : > { %502 = vst [vmem:[%s422_s6 + $0x90] sm:$0xff] (%p729_p4), %v501_v44 }
 0x14a   : > { %v399_v26 = vpop.permute.xlu1 %398  ;;  %v373_v27 = vpop.permute.xlu0 %372 }
 0x14b   : > { %598 = vst.msk [vmem:[%s752_s29 + $0x68] sm:$0xff] %vm361_vm1, %v399_v26  ;;  %590 = vst.msk [vmem:[%s752_s29 + $0x28] sm:$0xff] %vm361_vm1, %v373_v27 }
 0x14e   : > { %v371_v28 = vpop.permute.xlu0 %370  ;;  %v377_v29 = vpop.permute.xlu1 %376 }
 0x14f   : > { %589 = vst.msk [vmem:[%s752_s29 + $0x20] sm:$0xff] %vm361_vm1, %v371_v28  ;;  %592 = vst.msk [vmem:[%s752_s29 + $0x38] sm:$0xff] %vm361_vm1, %v377_v29 }
 0x152   : > { %v397_v30 = vpop.permute.xlu0 %396  ;;  %v375_v31 = vpop.permute.xlu1 %374  ;;  %v491_v39 = vld [vmem:[%s752_s29 + $0x28] sm:$0xff] (%p729_p4) }
 0x153   : > { %597 = vst.msk [vmem:[%s752_s29 + $0x60] sm:$0xff] %vm361_vm1, %v397_v30  ;;  %591 = vst.msk [vmem:[%s752_s29 + $0x30] sm:$0xff] %vm361_vm1, %v375_v31  ;;  %419 = sbr.rel (!%p729_p4) target bundleno = 352 (0x160), region = 32  ;;  %v507_v47 = vld [vmem:[%s752_s29 + $0x68] sm:$0xff] (%p729_p4) }
 0x154   : > { %492 = vst [vmem:[%s422_s6 + $0x48] sm:$0xff] (%p729_p4), %v491_v39  ;;  %508 = vst [vmem:[%s422_s6 + $0xc8] sm:$0xff] (%p729_p4), %v507_v47 }
 0x156   : > { %v401_v32 = vpop.permute.xlu0 %400  ;;  %v403_v33 = vpop.permute.xlu1 %402  ;;  %v489_v38 = vld [vmem:[%s752_s29 + $0x20] sm:$0xff] (%p729_p4)  ;;  %v495_v41 = vld [vmem:[%s752_s29 + $0x38] sm:$0xff] (%p729_p4) }
 0x157   : > { %599 = vst.msk [vmem:[%s752_s29 + $0x70] sm:$0xff] %vm361_vm1, %v401_v32  ;;  %600 = vst.msk [vmem:[%s752_s29 + $0x78] sm:$0xff] %vm361_vm1, %v403_v33 }
 0x158   : > { %490 = vst [vmem:[%s422_s6 + $0x40] sm:$0xff] %v489_v38  ;;  %496 = vst [vmem:[%s422_s6 + $0x58] sm:$0xff] %v495_v41 }
 0x15a   : > { %v493_v40 = vld [vmem:[%s752_s29 + $0x30] sm:$0xff]  ;;  %v505_v46 = vld [vmem:[%s752_s29 + $0x60] sm:$0xff] }
 0x15b   : > { %494 = vst [vmem:[%s422_s6 + $0x50] sm:$0xff] %v493_v40  ;;  %506 = vst [vmem:[%s422_s6 + $0xc0] sm:$0xff] %v505_v46 }
 0x15e   : > { %v509_v48 = vld [vmem:[%s752_s29 + $0x70] sm:$0xff]  ;;  %v511_v49 = vld [vmem:[%s752_s29 + $0x78] sm:$0xff] }
 0x15f   : > { %510 = vst [vmem:[%s422_s6 + $0xd0] sm:$0xff] %v509_v48  ;;  %512 = vst [vmem:[%s422_s6 + $0xd8] sm:$0xff] %v511_v49 }
 0x160 PF: > { %p9_p8 = scmp.ge.s32.totalorder %s719_s13, 4   ;;  %s822_s9 = smov %s682_s10 }
 0x161   : > { %s823_s10 = smov %s727_s16  ;;  %s824_s11 = smov %s719_s13 }
 0x162   :  { %11 = sbr.rel (!%p9_p8) target bundleno = 2 (0x2), region = 106 }

</bundles_post_ra>
